<compile_context>
chip_gen: v7x
topology: tpu7x:2x2x1
jax: 0.10.0
libtpu: 0.0.40
codegen_flags: <defaults>
</compile_context>

<pallas_src>
import functools
import math

import jax
import jax.numpy as jnp
from jax import lax
from jax.experimental import pallas as pl
from jax.experimental.pallas import tpu as pltpu


# ---------------------------------------------------------------------------
# Shared in-kernel conv helper
# ---------------------------------------------------------------------------
def _conv_tile(x_ref, w_ref, *, K, TtV, base, row_off, align, fold):
    """K-tap temporal conv for one (sample, T-tile) -> (Cout, Tt*V) f32 accumulator.

    fold=True : lane-concatenate the K shifted (TtV, Cin) windows and issue ONE MXU
                matmul with contraction K*Cin (w_ref is (Cout, K*Cin)).
    fold=False: K matmuls with contraction Cin, accumulated (w_ref is (K, Cout, Cin)).
    """
    def window(k):
        start = base + row_off[k]
        if align > 1:
            start = pl.multiple_of(start, align)
        return x_ref[0, pl.ds(start, TtV), :]                     # (Tt*V, Cin) bf16

    if fold:
        xs = [window(k) for k in range(K)]
        xcat = xs[0] if K == 1 else jnp.concatenate(xs, axis=1)   # (Tt*V, K*Cin)
        return lax.dot_general(                                   # (Cout, Tt*V) f32
            w_ref[...], xcat,
            dimension_numbers=(((1,), (1,)), ((), ())),
            preferred_element_type=jnp.float32)

    acc = None
    for k in range(K):                                            # K static: unrolled
        part = lax.dot_general(
            w_ref[k], window(k),
            dimension_numbers=(((1,), (1,)), ((), ())),
            preferred_element_type=jnp.float32)
        acc = part if acc is None else acc + part
    return acc


# ---------------------------------------------------------------------------
# Pass 1: conv (not materialized) -> packed partial batch statistics
# ---------------------------------------------------------------------------
def _stats_kernel(x_ref, w_ref, stat_ref, *, K, Tt, V, T_out, row_off, align, fold,
                  needs_mask):
    t_tile = pl.program_id(1)
    TtV = Tt * V
    acc = _conv_tile(x_ref, w_ref, K=K, TtV=TtV, base=t_tile * TtV,
                     row_off=row_off, align=align, fold=fold)

    def write(a):
        s = jnp.sum(a, axis=1)                                    # (Cout,) lane-reduce
        q = jnp.sum(a * a, axis=1)
        stat_ref[...] = jnp.stack([s, q], axis=0)[None, None]     # (1, 1, 2, Cout)

    if not needs_mask:                                            # T_out tiles evenly
        write(acc)
    else:
        last = pl.num_programs(1) - 1

        @pl.when(t_tile == last)        # ragged last tile: mask tile-padding rows
        def _():
            col = lax.broadcasted_iota(jnp.int32, acc.shape, 1)
            valid = (t_tile * Tt + col // V) < T_out
            write(jnp.where(valid, acc, 0.0))

        @pl.when(t_tile != last)        # fast path: no iota / where / extra temp
        def _():
            write(acc)


# ---------------------------------------------------------------------------
# Pass 2: recompute conv + apply BatchNorm, single lane-dense output write
# ---------------------------------------------------------------------------
def _conv_bn_kernel(x_ref, w_ref, scale_ref, shift_ref, o_ref, *, K, Tt, V,
                    row_off, align, fold):
    t_tile = pl.program_id(1)
    TtV = Tt * V
    acc = _conv_tile(x_ref, w_ref, K=K, TtV=TtV, base=t_tile * TtV,
                     row_off=row_off, align=align, fold=fold)
    o_ref[...] = (acc[None] * scale_ref[...] + shift_ref[...]).astype(o_ref.dtype)


def _choose_t_tile(T_out, V, target_rows):
    """Output-time tile: Tt*V rows per step, lane-dense (multiple of 128) or full."""
    if T_out * V <= target_rows:
        return T_out                                # single tile: block == full dim
    g = 128 // math.gcd(V, 128)                     # smallest Tt with Tt*V % 128 == 0
    tt = max(g, (target_rows // (V * g)) * g)
    return min(tt, -(-T_out // g) * g)


def temporal_conv_bn(x, w, b, gamma, beta, *, stride=1, dilation=1, eps=1e-5,
                     compute_dtype=jnp.bfloat16, target_rows=2048):
    del b  # conv bias is a no-op under training-mode BatchNorm (batch mean absorbs it)

    N, Cin, T, V = x.shape
    Cout, _, K, _ = w.shape
    pad = (K + (K - 1) * (dilation - 1) - 1) // 2
    T_out = (T + 2 * pad - dilation * (K - 1) - 1) // stride + 1

    # ---- per-generation VMEM budget (v7x: 64 MiB physical; v5e/v6e: 128 MiB) ----
    try:
        vmem_cap = int(pltpu.get_tpu_info().vmem_capacity_bytes)
    except Exception:
        vmem_cap = 64 * 1024 * 1024
    vmem_limit = min((vmem_cap * 5) // 8, 96 * 1024 * 1024)
    if vmem_cap >= 96 * 1024 * 1024:
        target_rows *= 2                            # bigger T tiles on v5e/v6e

    Tt = _choose_t_tile(T_out, V, target_rows)
    nTt = pl.cdiv(T_out, Tt)
    Tp = nTt * Tt                                   # tile-padded output length
    TtV = Tt * V

    # ---- glue: pad, channels-last, flatten (T, V) rows, cast to bf16 (one pass) ----
    if stride == 1:
        T_in = Tp + (K - 1) * dilation
        xp = jnp.pad(x, ((0, 0), (0, 0), (pad, T_in - T - pad), (0, 0)))
        X = xp.transpose(0, 2, 3, 1).reshape(N, T_in * V, Cin).astype(compute_dtype)
        row_off = tuple(k * dilation * V for k in range(K))
    else:
        # TODO(synk): the strided path still stacks K shifted taps (K-fold input
        # duplication); the stride==1 hot path above avoids any duplication.
        xp = jnp.pad(x, ((0, 0), (0, 0), (pad, pad), (0, 0)))
        taps = []
        for k in range(K):
            s0 = k * dilation
            tap = lax.slice(xp, (0, 0, s0, 0),
                            (N, Cin, s0 + stride * (T_out - 1) + 1, V),
                            (1, 1, stride, 1))
            taps.append(jnp.pad(tap, ((0, 0), (0, 0), (0, Tp - T_out), (0, 0))))
        X = (jnp.concatenate(taps, axis=2)
             .transpose(0, 2, 3, 1).reshape(N, K * Tp * V, Cin).astype(compute_dtype))
        row_off = tuple(k * Tp * V for k in range(K))
    R = X.shape[1]

    # ---- weights: fold K taps into the contraction when K*Cin is MXU-small ----
    fold = (K * Cin) <= 256
    if fold:
        W = (jnp.transpose(w[..., 0], (0, 2, 1))                    # (Cout, K, Cin)
             .reshape(Cout, K * Cin).astype(compute_dtype))
        w_spec = pl.BlockSpec((Cout, K * Cin), lambda n, t: (0, 0))
    else:
        W = jnp.transpose(w[..., 0], (2, 0, 1)).astype(compute_dtype)  # (K, Cout, Cin)
        w_spec = pl.BlockSpec((K, Cout, Cin), lambda n, t: (0, 0, 0))

    cparams = pltpu.CompilerParams(
        dimension_semantics=("parallel", "parallel"),
        vmem_limit_bytes=int(vmem_limit))

    # One sample's bf16 slab stays resident across its T tiles (block index fixed in t).
    x_spec = pl.BlockSpec((1, R, Cin), lambda n, t: (n, 0, 0))
    # TODO(synk): for very large per-sample slabs on v7x (64 MiB VMEM), switch to a
    # per-T-tile window with a (K-1)*dilation*V halo instead of the whole-sample slab.

    align = V & (-V)
    common = dict(K=K, Tt=Tt, V=V, row_off=row_off, align=align, fold=fold)

    # ---- pass 1: conv -> packed per-(sample, T-tile) partial (sum, sumsq) ----
    stats = pl.pallas_call(
        functools.partial(_stats_kernel, T_out=T_out,
                          needs_mask=(Tp != T_out), **common),
        grid=(N, nTt),
        in_specs=[x_spec, w_spec],
        out_specs=pl.BlockSpec((1, 1, 2, Cout), lambda n, t: (n, t, 0, 0)),
        out_shape=jax.ShapeDtypeStruct((N, nTt, 2, Cout), jnp.float32),
        compiler_params=cparams,
    )(X, W)

    # ---- tiny per-channel scalar glue: fold the batch stats into scale/shift ----
    M = N * T_out * V
    s1 = jnp.sum(stats[:, :, 0, :], axis=(0, 1))                    # (Cout,)
    s2 = jnp.sum(stats[:, :, 1, :], axis=(0, 1))
    mean = s1 / M
    # E[x^2] - E[x]^2 in f32, clamped; fine at the widened bf16-MXU tolerance.
    var = jnp.maximum(s2 / M - mean * mean, 0.0)
    inv = lax.rsqrt(var + eps)
    g = gamma.astype(jnp.float32)
    scale = (g * inv).reshape(1, Cout, 1)
    shift = (beta.astype(jnp.float32) - mean * g * inv).reshape(1, Cout, 1)

    # ---- pass 2: recompute conv + apply BN, single lane-dense final write ----
    out = pl.pallas_call(
        functools.partial(_conv_bn_kernel, **common),
        grid=(N, nTt),
        in_specs=[
            x_spec, w_spec,
            pl.BlockSpec((1, Cout, 1), lambda n, t: (0, 0, 0)),
            pl.BlockSpec((1, Cout, 1), lambda n, t: (0, 0, 0)),
        ],
        out_specs=pl.BlockSpec((1, Cout, TtV), lambda n, t: (n, 0, t)),
        out_shape=jax.ShapeDtypeStruct((N, Cout, Tp * V), jnp.float32),
        compiler_params=cparams,
    )(X, W, scale, shift)

    # NCHW result: free reshape + slice off the T tile padding (no transpose pass).
    return out.reshape(N, Cout, Tp, V)[:, :, :T_out, :]


def reference(x, w, b, gamma, beta, *, stride=1, dilation=1, eps=1e-5):
    K = w.shape[2]
    pad = (K + (K - 1) * (dilation - 1) - 1) // 2
    y = lax.conv_general_dilated(
        x, w,
        window_strides=(stride, 1),
        padding=((pad, pad), (0, 0)),
        rhs_dilation=(dilation, 1),
        dimension_numbers=("NCHW", "OIHW", "NCHW"),
    )
    y = y + b.reshape(1, -1, 1, 1)
    mean = jnp.mean(y, axis=(0, 2, 3), keepdims=True)
    var = jnp.mean((y - mean) ** 2, axis=(0, 2, 3), keepdims=True)
    return (y - mean) * lax.rsqrt(var + eps) * gamma.reshape(1, -1, 1, 1) + beta.reshape(1, -1, 1, 1)


if __name__ == "__main__":
    # Small shapes consistent with the module's forward (NCHW temporal conv).
    N, C_in, C_out, T, V = 2, 4, 8, 16, 16
    K, stride, dilation = 3, 1, 1

    key = jax.random.PRNGKey(0)
    kx, kw, kb, kg, kbe = jax.random.split(key, 5)
    x = jax.random.normal(kx, (N, C_in, T, V), dtype=jnp.float32)
    w = jax.random.normal(kw, (C_out, C_in, K, 1), dtype=jnp.float32) * 0.1
    b = jax.random.normal(kb, (C_out,), dtype=jnp.float32) * 0.1
    gamma = 1.0 + 0.1 * jax.random.normal(kg, (C_out,), dtype=jnp.float32)
    beta = 0.1 * jax.random.normal(kbe, (C_out,), dtype=jnp.float32)

    out = temporal_conv_bn(x, w, b, gamma, beta, stride=stride, dilation=dilation)
    out = jax.block_until_ready(out)

    ref = jax.block_until_ready(reference(x, w, b, gamma, beta, stride=stride, dilation=dilation))
    assert out.shape == ref.shape
    # bf16 MXU inputs -> slightly widened tolerance vs f32 reference.
    assert jnp.allclose(out, ref, atol=2e-2, rtol=2e-2), "mismatch vs pure-JAX reference"

    print("KERNEL_OK")
</pallas_src>

<mosaic_0001>
module attributes {stable_mosaic.version = 11 : i64} {
  func.func @_stats_kernel(%arg0: i32, %arg1: i32, %arg2: memref<1x288x4xbf16, #tpu.memory_space<vmem>>, %arg3: memref<8x12xbf16, #tpu.memory_space<vmem>>, %arg4: memref<1x1x2x8xf32, #tpu.memory_space<vmem>>) attributes {dimension_semantics = [#tpu.dimension_semantics<parallel>, #tpu.dimension_semantics<parallel>], iteration_bounds = array<i64: 2, 1>, scalar_prefetch = 0 : i64, scratch_operands = 0 : i64, tpu.core_type = #tpu.core_type<tc>, window_params = [{transform_indices = @transform_0, window_bounds = array<i64: 1, 288, 4>}, {pipeline_mode = #tpu.pipeline_mode<synchronous>, transform_indices = @transform_1, window_bounds = array<i64: 8, 12>}, {transform_indices = @transform_2, window_bounds = array<i64: 1, 1, 2, 8>}]} {
    %c256_i32 = arith.constant 256 : i32
    %0 = arith.muli %arg1, %c256_i32 : i32
    %c0_i32 = arith.constant 0 : i32
    %1 = arith.addi %0, %c0_i32 : i32
    %2 = tpu.assume_multiple %1, 16 : i32
    %c0 = arith.constant 0 : index
    %3 = arith.index_cast %2 : i32 to index
    %c0_0 = arith.constant 0 : index
    %4 = vector.load %arg2[%c0, %3, %c0_0] : memref<1x288x4xbf16, #tpu.memory_space<vmem>>, vector<1x256x4xbf16>
    %5 = vector.shape_cast %4 : vector<1x256x4xbf16> to vector<256x4xbf16>
    %c16_i32 = arith.constant 16 : i32
    %6 = arith.addi %0, %c16_i32 : i32
    %7 = tpu.assume_multiple %6, 16 : i32
    %c0_1 = arith.constant 0 : index
    %8 = arith.index_cast %7 : i32 to index
    %c0_2 = arith.constant 0 : index
    %9 = vector.load %arg2[%c0_1, %8, %c0_2] : memref<1x288x4xbf16, #tpu.memory_space<vmem>>, vector<1x256x4xbf16>
    %10 = vector.shape_cast %9 : vector<1x256x4xbf16> to vector<256x4xbf16>
    %c32_i32 = arith.constant 32 : i32
    %11 = arith.addi %0, %c32_i32 : i32
    %12 = tpu.assume_multiple %11, 16 : i32
    %c0_3 = arith.constant 0 : index
    %13 = arith.index_cast %12 : i32 to index
    %c0_4 = arith.constant 0 : index
    %14 = vector.load %arg2[%c0_3, %13, %c0_4] : memref<1x288x4xbf16, #tpu.memory_space<vmem>>, vector<1x256x4xbf16>
    %15 = vector.shape_cast %14 : vector<1x256x4xbf16> to vector<256x4xbf16>
    %16 = tpu.concatenate %5, %10, %15 in 1 : vector<256x4xbf16>, vector<256x4xbf16>, vector<256x4xbf16> -> vector<256x12xbf16>
    %c0_5 = arith.constant 0 : index
    %c0_6 = arith.constant 0 : index
    %17 = vector.load %arg3[%c0_5, %c0_6] : memref<8x12xbf16, #tpu.memory_space<vmem>>, vector<8x12xbf16>
    %cst = arith.constant dense<0.000000e+00> : vector<8x256xf32>
    %18 = tpu.matmul %17, %16, %cst {dimension_numbers = #tpu.dot_dimension_numbers<[1], [1], [0], [0], [0, 0, 1, 0], [], []>} : vector<8x12xbf16>, vector<256x12xbf16>, vector<8x256xf32> -> vector<8x256xf32>
    %cst_7 = arith.constant dense<0.000000e+00> : vector<8xf32>
    %19 = vector.multi_reduction <add>, %18, %cst_7 [1] : vector<8x256xf32> to vector<8xf32>
    %20 = arith.mulf %18, %18 : vector<8x256xf32>
    %cst_8 = arith.constant dense<0.000000e+00> : vector<8xf32>
    %21 = vector.multi_reduction <add>, %20, %cst_8 [1] : vector<8x256xf32> to vector<8xf32>
    %22 = vector.shape_cast %19 : vector<8xf32> to vector<1x8xf32>
    %23 = vector.shape_cast %21 : vector<8xf32> to vector<1x8xf32>
    %24 = tpu.concatenate %22, %23 in 0 : vector<1x8xf32>, vector<1x8xf32> -> vector<2x8xf32>
    %25 = vector.shape_cast %24 : vector<2x8xf32> to vector<1x1x2x8xf32>
    %c0_9 = arith.constant 0 : index
    %c0_10 = arith.constant 0 : index
    %c0_11 = arith.constant 0 : index
    %c0_12 = arith.constant 0 : index
    %26 = vector.load %arg4[%c0_9, %c0_10, %c0_11, %c0_12] : memref<1x1x2x8xf32, #tpu.memory_space<vmem>>, vector<1x1x2x8xf32>
    tpu.vector_store %arg4[%c0_9, %c0_10, %c0_11, %c0_12], %25 {strides = array<i32>} : memref<1x1x2x8xf32, #tpu.memory_space<vmem>>, vector<1x1x2x8xf32>,
    return
  }
  func.func @transform_0(%arg0: i32, %arg1: i32) -> (i32, i32, i32) {
    %c0_i32 = arith.constant 0 : i32
    %c0_i32_0 = arith.constant 0 : i32
    %c0_i32_1 = arith.constant 0 : i32
    return %arg0, %c0_i32, %c0_i32_0 : i32, i32, i32
  }
  func.func @transform_1(%arg0: i32, %arg1: i32) -> (i32, i32) {
    %c0_i32 = arith.constant 0 : i32
    %c0_i32_0 = arith.constant 0 : i32
    %c0_i32_1 = arith.constant 0 : i32
    return %c0_i32, %c0_i32_0 : i32, i32
  }
  func.func @transform_2(%arg0: i32, %arg1: i32) -> (i32, i32, i32, i32) {
    %c0_i32 = arith.constant 0 : i32
    %c0_i32_0 = arith.constant 0 : i32
    %c0_i32_1 = arith.constant 0 : i32
    return %arg0, %arg1, %c0_i32, %c0_i32_0 : i32, i32, i32, i32
  }
}

</mosaic_0001>

<bundles_post_ra>
// kernel: tpu_custom_call.1
= control target key start
LH: loop header
LB: loop body
LE: loop exit
PB: predicated region body
PF: predicated region fallthrough
CT: control target
= control target key end

     0   :  { %7 = vsyncpa [#allocation3], 0  ;;  %s1452_s0 = inlined_call_operand.vmem [shape: bf16[2,288,4], index: 0, kind: input, shape index: {}]   ;;  %s1453_s1 = inlined_call_operand.vmem [shape: bf16[8,12], index: 1, kind: input, shape index: {}]   ;;  %s1454_s2 = inlined_call_operand.hbm [shape: f32[2,1,2,8], index: 2, kind: output, shape index: {}]  }
   0x1   :  { %9 = vsyncpa [#allocation3 + $0x1], 0  ;;  %s1201_s9 = smov 0   ;;  %s1203_s10 = smov 0  }
   0x2   :  { %s1205_s11 = smov 0   ;;  %s1207_s12 = smov 0  }
   0x3   :  { %s1209_s13 = smov 0   ;;  %s1211_s14 = smov 0  }
   0x4 LB: > { %s847_s15 = sadd.s32 4294967295, %s1181_s14   ;;  %s848_s16 = sadd.s32 4294967294, %s1181_s14   ;;  %s1181_s14 = sphi %s1211_s14, %s15_s14   ;;  %s1177_s13 = sphi %s1209_s13, %s1461_s13   ;;  %s1173_s12 = sphi %s1207_s12, %s1460_s12   ;;  %s1169_s11 = sphi %s1205_s11, %s1459_s11   ;;  %s1165_s10 = sphi %s1203_s10, %s1458_s10   ;;  %s1161_s9 = sphi %s1201_s9, %s1457_s9  }
   0x5   : > { %s27_s17 = sadd.s32 1, %s1177_s13  ;;  %s83_s18 = sadd.s32 1, %s1169_s11 }
   0x6   : > { %p29_p0 = scmp.ge.s32.totalorder %s27_s17, 2  ;;  %p93_p1 = scmp.ne.s32.totalorder %s1169_s11, %s1165_s10 }
   0x7   : > { %p94_p2 = scmp.eq.s32.totalorder %s847_s15, 1  ;;  %p99_p3 = scmp.ne.s32.totalorder %s1165_s10, %s1161_s9 }
   0x8   : > { %s1463_s17 = smov (%p29_p0, %s27_s17), 0  ;;  %p100_p5 = scmp.eq.s32.totalorder %s848_s16, 1 }
   0x9   : > { %p1241_p4 = por %p94_p2, %p93_p1  ;;  %s78_s20 = ssub.s32 %s1177_s13, %s1463_s17 }
   0xa   : > { %p851_p6 = scmp.ge.s32.totalorder %s1181_s14, 1  ;;  %p81_p7 = scmp.eq.s32.totalorder %s78_s20, 0 }
   0xb   : > { %p1248_p8 = por %p100_p5, %p99_p3  ;;  %p129_p9 = scmp.lt.s32.totalorder %s1181_s14, 3 }
   0xc   : > { %s1254_s22 = scalar_select %p81_p7, %s1169_s11, %s83_s18  }
   0xd   : > { %p130_p10 = pnand %p851_p6, %p129_p9 }
   0xe   : > { %p151_p11 = scmp.lt.s32.totalorder (!%p130_p10), %s1173_s12, 1  ;;  %s1183_s28 = smov (!%p130_p10), 8   ;;  %vm655_vm0 = vcmask (!%p130_p10), 97280   ;;  %v1320_v28 = vld [vmem:[%s1453_s1] sm:$0xf] (!%p130_p10)  ;;  %vm572_vm1 = vcmask (!%p130_p10), 31744  }
   0xf   : > { %133 = sbr.rel (%p130_p10) target bundleno = 589 (0x24d), region = 28  ;;  %s1184_s29 = smov (!%p130_p10), 4   ;;  %987 = vmatprep.mubr.msk.bf16.mxu0 (!%p130_p10), %vm655_vm0, %v1320_v28  ;;  %vm621_vm2 = vcmask (!%p130_p10), 64512   ;;  %vm754_vm3 = vcmask (!%p130_p10), 1040384   ;;  %vm756_vm4 = vcmask (!%p130_p10), 58368  }
  0x10   : > { %s148_s4 = sand.u32 (!%p130_p10), 1, %s1165_s10   ;;  %s968_s6 = sshll.u32 (!%p130_p10), %s1173_s12, 5 }
  0x11   : > { %s852_s5 = sshll.u32 (!%p130_p10), %s148_s4, 1  ;;  %s1405_s18 = scalar_lea.hbm (!%p130_p10), %s1454_s2, %s968_s6 }
  0x12   : > { %s150_s7 = scalar_lea.vmem (!%p130_p10), [#allocation2], %s852_s5 }
  0x13   : > { %s773_s8 = sshll.u32 (!%p130_p10), %s150_s7, 4  ;;  %s1407_s8 = int_to_ptr.vmem [resolvable:$true] %s773_s8 }
  0x14   : > { %s1103_s20 = scalar_lea.vmem (!%p130_p10), %s1407_s8, 32 }
  0x15   : > { %p1104_p12 = scmp.ne.s32.totalorder (!%p130_p10), %s1407_s8, %s1103_s20 }
  0x16   : > { %s152_s23 = scalar_select %p151_p11, %s1173_s12, 1 }
  0x17   : > { %s759_s12 = scalar_lea.sflag [#allocation3], %s148_s4  ;;  %p1105_p13 = pnand %p1104_p12, %p1241_p4 }
  0x18   : > { %s997_s24 = smul.u32 144, %s152_s23  ;;  %s1185_s23 = smov [#allocation2]  }
  0x19   : > { %p1106_p0 = pneg %p1105_p13 }
  0x1a   : > { %s1261_s27 = scalar_lea.vmem %s1452_s0, %s997_s24  ;;  %s1107_s24 = sshll.u32 %s1185_s23, 4  ;;  %s1108_s24 = int_to_ptr.vmem [resolvable:$false] %s1107_s24 }
  0x1b   : > { %v1055_v0 = vld [vmem:[%s1261_s27 + $0x10] sm:$0xff]   ;;  %v1056_v1 = vld [vmem:[%s1261_s27 + $0x8] sm:$0xff]   ;;  %v1061_v6 = vld [vmem:[%s1261_s27 + $0x58] sm:$0xff]   ;;  %s1109_s25 = scalar_lea.vmem %s1108_s24, 64  ;;  %p1110_p1 = scmp.lt.s32.totalorder %s1407_s8, %s1108_s24 }
  0x1c   : > { %540 = vrot.lane.b32.xlu1 %v1055_v0, %s1183_s28  ;;  %v1057_v2 = vld [vmem:[%s1261_s27 + $0x50] sm:$0xff]   ;;  %428 = vrot.lane.b32.xlu0 %v1056_v1, %s1184_s29  ;;  %v1058_v3 = vld [vmem:[%s1261_s27 + $0x48] sm:$0xff]   ;;  %p1111_p2 = scmp.lt.s32.totalorder %s1109_s25, %s1103_s20 }
  0x1d   : > { %v1059_v4 = vld [vmem:[%s1261_s27 + $0x50] sm:$0xff]   ;;  %v1062_v7 = vld [vmem:[%s1261_s27 + $0x18] sm:$0xff]   ;;  %v1065_v10 = vld [vmem:[%s1261_s27 + $0x60] sm:$0xff]  }
  0x1e   : > { %v1060_v5 = vld [vmem:[%s1261_s27 + $0x10] sm:$0xff]   ;;  %v1063_v8 = vld [vmem:[%s1261_s27 + $0x58] sm:$0xff]   ;;  %v1066_v11 = vld [vmem:[%s1261_s27 + $0x20] sm:$0xff]   ;;  %p1112_p3 = por %p1111_p2, %p1110_p1 }
  0x1f   : > { %v1064_v9 = vld [vmem:[%s1261_s27 + $0x18] sm:$0xff]   ;;  %v1067_v12 = vld [vmem:[%s1261_s27 + $0x60] sm:$0xff]   ;;  %v1069_v14 = vld [vmem:[%s1261_s27 + $0x68] sm:$0xff]  }
  0x20   : > { %556 = vrot.lane.b32.xlu1 %v1057_v2, %s1183_s28  ;;  %444 = vrot.lane.b32.xlu0 %v1058_v3, %s1184_s29  ;;  %v1068_v13 = vld [vmem:[%s1261_s27 + $0x20] sm:$0xff]   ;;  %v1070_v15 = vld [vmem:[%s1261_s27 + $0x28] sm:$0xff]   ;;  %p1113_p5 = pnand %p1112_p3, %p1106_p0 }
  0x21   : > { %v1071_v16 = vld [vmem:[%s1261_s27 + $0x68] sm:$0xff]   ;;  %v1073_v18 = vld [vmem:[%s1261_s27 + $0x70] sm:$0xff]   ;;  %v1077_v22 = vld [vmem:[%s1261_s27 + $0x78] sm:$0xff]  }
  0x22   : > { %v1072_v17 = vld [vmem:[%s1261_s27 + $0x28] sm:$0xff]   ;;  %v1074_v19 = vld [vmem:[%s1261_s27 + $0x30] sm:$0xff]   ;;  %v1078_v23 = vld [vmem:[%s1261_s27 + $0x38] sm:$0xff]  }
  0x23   : > { %v1075_v20 = vld [vmem:[%s1261_s27 + $0x70] sm:$0xff]   ;;  %v1079_v24 = vld [vmem:[%s1261_s27 + $0x78] sm:$0xff]   ;;  %v1081_v26 = vld [vmem:[%s1261_s27 + $0x80] sm:$0xff]  }
  0x24   : > { %446 = vrot.lane.b32.xlu1 %v1059_v4, %s1184_s29  ;;  %430 = vrot.lane.b32.xlu0 %v1060_v5, %s1184_s29  ;;  %v1076_v21 = vld [vmem:[%s1261_s27 + $0x30] sm:$0xff]   ;;  %v1080_v25 = vld [vmem:[%s1261_s27 + $0x38] sm:$0xff]  }
  0x25   : > { %v1082_v27 = vld [vmem:[%s1261_s27 + $0x40] sm:$0xff]   ;;  %v1085_v31 = vld [vmem:[%s1261_s27 + $0x88] sm:$0xff]   ;;  %v1091_v56 = vld [vmem:[%s1261_s27 + $0x50] sm:$0xff]  }
  0x26   : > { %v1083_v29 = vld [vmem:[%s1261_s27 + $0x80] sm:$0xff]   ;;  %v1086_v32 = vld [vmem:[%s1261_s27 + $0x48] sm:$0xff]   ;;  %v1092_v58 = vld [vmem:[%s1261_s27 + $0x10] sm:$0xff]  }
  0x27   : > { %v1084_v30 = vld [vmem:[%s1261_s27 + $0x40] sm:$0xff]   ;;  %v1089_v44 = vld [vmem:[%s1261_s27 + $0x48] sm:$0xff]   ;;  %v1093_v3 = vld [vmem:[%s1261_s27 + $0x58] sm:$0xff]  }
  0x28   : > { %558 = vrot.lane.b32.xlu1 %v1061_v6, %s1183_s28  ;;  %542 = vrot.lane.b32.xlu0 %v1062_v7, %s1183_s28  ;;  %v1087_v33 = vld [vmem:[%s1261_s27] sm:$0xff]   ;;  %v1090_v47 = vld [vmem:[%s1261_s27 + $0x8] sm:$0xff]  }
  0x29   : > { %v1088_v37 = vld [vmem:[%s1261_s27 + $0x40] sm:$0xff]   ;;  %v1094_v5 = vld [vmem:[%s1261_s27 + $0x18] sm:$0xff]  }
  0x2c   : > { %448 = vrot.lane.b32.xlu1 %v1063_v8, %s1184_s29  ;;  %432 = vrot.lane.b32.xlu0 %v1064_v9, %s1184_s29 }
  0x30   : > { %560 = vrot.lane.b32.xlu1 %v1065_v10, %s1183_s28  ;;  %544 = vrot.lane.b32.xlu0 %v1066_v11, %s1183_s28 }
  0x34   : > { %450 = vrot.lane.b32.xlu1 %v1067_v12, %s1184_s29  ;;  %434 = vrot.lane.b32.xlu0 %v1068_v13, %s1184_s29 }
  0x38   : > { %562 = vrot.lane.b32.xlu1 %v1069_v14, %s1183_s28  ;;  %546 = vrot.lane.b32.xlu0 %v1070_v15, %s1183_s28  ;;  %v1095_v14 = vld [vmem:[%s1261_s27 + $0x60] sm:$0xff]  }
  0x3c   : > { %452 = vrot.lane.b32.xlu1 %v1071_v16, %s1184_s29  ;;  %436 = vrot.lane.b32.xlu0 %v1072_v17, %s1184_s29  ;;  %v1096_v16 = vld [vmem:[%s1261_s27 + $0x20] sm:$0xff]  }
  0x40   : > { %564 = vrot.lane.b32.xlu1 %v1073_v18, %s1183_s28  ;;  %548 = vrot.lane.b32.xlu0 %v1074_v19, %s1183_s28 }
  0x44   : > { %454 = vrot.lane.b32.xlu1 %v1075_v20, %s1184_s29  ;;  %438 = vrot.lane.b32.xlu0 %v1076_v21, %s1184_s29 }
  0x48   : > { %566 = vrot.lane.b32.xlu1 %v1077_v22, %s1183_s28  ;;  %550 = vrot.lane.b32.xlu0 %v1078_v23, %s1183_s28 }
  0x4c   : > { %456 = vrot.lane.b32.xlu1 %v1079_v24, %s1184_s29  ;;  %440 = vrot.lane.b32.xlu0 %v1080_v25, %s1184_s29  ;;  %v1097_v25 = vld [vmem:[%s1261_s27 + $0x68] sm:$0xff]  }
  0x50   : > { %568 = vrot.lane.b32.xlu1 %v1081_v26, %s1183_s28  ;;  %552 = vrot.lane.b32.xlu0 %v1082_v27, %s1183_s28  ;;  %v1098_v27 = vld [vmem:[%s1261_s27 + $0x28] sm:$0xff]  }
  0x54   : > { %458 = vrot.lane.b32.xlu1 %v1083_v29, %s1184_s29  ;;  %442 = vrot.lane.b32.xlu0 %v1084_v30, %s1184_s29 }
  0x58   : > { %570 = vrot.lane.b32.xlu1 %v1085_v31, %s1183_s28  ;;  %554 = vrot.lane.b32.xlu0 %v1086_v32, %s1183_s28 }
  0x8e   : > { %v541_v34 = vpop.permute.xlu1 %540  ;;  %v429_v35 = vpop.permute.xlu0 %428 }
  0x8f   : > { %v575_v36 = vsel %vm572_vm1, %v1087_v33, %v429_v35 }
  0x90   : > { %v623_v40 = vsel %vm621_vm2, %v575_v36, %v541_v34 }
  0x91   : > { %v659_v45 = vsel %vm655_vm0, %v623_v40, 0 }
  0x92   : > { %v557_v38 = vpop.permute.xlu1 %556  ;;  %v445_v39 = vpop.permute.xlu0 %444 }
  0x93   : > { %v599_v41 = vsel %vm572_vm1, %v1088_v37, %v445_v39  ;;  %v1099_v37 = vld [vmem:[%s1261_s27 + $0x70] sm:$0xff]  }
  0x94   : > { %v639_v42 = vsel %vm621_vm2, %v599_v41, %v557_v38  ;;  %v1100_v39 = vld [vmem:[%s1261_s27 + $0x30] sm:$0xff]  }
  0x95   : > { %989 = vmatprep.subr.msk.bf16.mxu0 %vm655_vm0, %v639_v42 }
  0x96   : > { %v447_v43 = vpop.permute.xlu1 %446  ;;  %v431_v46 = vpop.permute.xlu0 %430  ;;  %972 = vmatpush3.bf16.xpose.msra.mxu0 %v659_v45 }
  0x97   : > { %v602_v48 = vsel %vm572_vm1, %v1089_v44, %v447_v43  ;;  %v578_v50 = vsel %vm572_vm1, %v1090_v47, %v431_v46 }
  0x9a   : > { %v559_v49 = vpop.permute.xlu1 %558  ;;  %v543_v52 = vpop.permute.xlu0 %542 }
  0x9b   : > { %v641_v51 = vsel %vm621_vm2, %v602_v48, %v559_v49  ;;  %v625_v53 = vsel %vm621_vm2, %v578_v50, %v543_v52  ;;  %v1101_v48 = vld [vmem:[%s1261_s27 + $0x78] sm:$0xff]  }
  0x9c   : > { %990 = vmatprep.subr.msk.bf16.mxu0 %vm655_vm0, %v641_v51  ;;  %v661_v54 = vsel %vm655_vm0, %v625_v53, 0  ;;  %v1102_v50 = vld [vmem:[%s1261_s27 + $0x38] sm:$0xff]  }
  0x9e   : > { %v449_v55 = vpop.permute.xlu1 %448  ;;  %v433_v57 = vpop.permute.xlu0 %432  ;;  %974 = vmatpush3.bf16.xpose.msra.mxu0 %v661_v54 }
  0x9f   : > { %v605_v59 = vsel %vm572_vm1, %v1091_v56, %v449_v55  ;;  %v581_v61 = vsel %vm572_vm1, %v1092_v58, %v433_v57 }
  0xa2   : > { %v561_v60 = vpop.permute.xlu1 %560  ;;  %v545_v63 = vpop.permute.xlu0 %544 }
  0xa3   : > { %v643_v62 = vsel %vm621_vm2, %v605_v59, %v561_v60  ;;  %v627_v0 = vsel %vm621_vm2, %v581_v61, %v545_v63 }
  0xa4   : > { %991 = vmatprep.subr.msk.bf16.mxu0 %vm655_vm0, %v643_v62  ;;  %v663_v1 = vsel %vm655_vm0, %v627_v0, 0 }
  0xa6   : > { %v451_v2 = vpop.permute.xlu1 %450  ;;  %v435_v4 = vpop.permute.xlu0 %434  ;;  %976 = vmatpush3.bf16.xpose.msra.mxu0 %v663_v1 }
  0xa7   : > { %v608_v6 = vsel %vm572_vm1, %v1093_v3, %v451_v2  ;;  %v584_v8 = vsel %vm572_vm1, %v1094_v5, %v435_v4  ;;  %v741_v2 = vlaneseq }
  0xa9   : > { %v742_v3 = vand.u32 127, %v741_v2  ;;  %v744_v4 = vshrl.u32 %v741_v2, 7 }
  0xaa   : > { %v563_v7 = vpop.permute.xlu1 %562  ;;  %v547_v10 = vpop.permute.xlu0 %546 }
  0xab   : > { %v645_v9 = vsel %vm621_vm2, %v608_v6, %v563_v7  ;;  %v629_v11 = vsel %vm621_vm2, %v584_v8, %v547_v10  ;;  %v745_v5 = vsub.s32 %v742_v3, %v744_v4 }
  0xac   : > { %992 = vmatprep.subr.msk.bf16.mxu0 %vm655_vm0, %v645_v9  ;;  %v665_v12 = vsel %vm655_vm0, %v629_v11, 0 }
  0xae   : > { %v453_v13 = vpop.permute.xlu1 %452  ;;  %v437_v15 = vpop.permute.xlu0 %436  ;;  %978 = vmatpush3.bf16.xpose.msra.mxu0 %v665_v12 }
  0xaf   : > { %v611_v17 = vsel %vm572_vm1, %v1095_v14, %v453_v13  ;;  %v587_v19 = vsel %vm572_vm1, %v1096_v16, %v437_v15 }
  0xb2   : > { %v565_v18 = vpop.permute.xlu1 %564  ;;  %v549_v21 = vpop.permute.xlu0 %548 }
  0xb3   : > { %v647_v20 = vsel %vm621_vm2, %v611_v17, %v565_v18  ;;  %v631_v22 = vsel %vm621_vm2, %v587_v19, %v549_v21 }
  0xb4   : > { %993 = vmatprep.subr.msk.bf16.mxu0 %vm655_vm0, %v647_v20  ;;  %v667_v23 = vsel %vm655_vm0, %v631_v22, 0 }
  0xb6   : > { %v455_v24 = vpop.permute.xlu1 %454  ;;  %v439_v26 = vpop.permute.xlu0 %438  ;;  %980 = vmatpush3.bf16.xpose.msra.mxu0 %v667_v23 }
  0xb7   : > { %v614_v29 = vsel %vm572_vm1, %v1097_v25, %v455_v24  ;;  %v590_v31 = vsel %vm572_vm1, %v1098_v27, %v439_v26 }
  0xba   : > { %v567_v30 = vpop.permute.xlu1 %566  ;;  %v551_v33 = vpop.permute.xlu0 %550 }
  0xbb   : > { %v649_v32 = vsel %vm621_vm2, %v614_v29, %v567_v30  ;;  %v633_v34 = vsel %vm621_vm2, %v590_v31, %v551_v33 }
  0xbc   : > { %994 = vmatprep.subr.msk.bf16.mxu0 %vm655_vm0, %v649_v32  ;;  %v669_v35 = vsel %vm655_vm0, %v633_v34, 0 }
  0xbe   : > { %v457_v36 = vpop.permute.xlu1 %456  ;;  %v441_v38 = vpop.permute.xlu0 %440  ;;  %982 = vmatpush3.bf16.xpose.msra.mxu0 %v669_v35 }
  0xbf   : > { %v617_v40 = vsel %vm572_vm1, %v1099_v37, %v457_v36  ;;  %v593_v42 = vsel %vm572_vm1, %v1100_v39, %v441_v38 }
  0xc2   : > { %v569_v41 = vpop.permute.xlu1 %568  ;;  %v553_v44 = vpop.permute.xlu0 %552 }
  0xc3   : > { %v651_v43 = vsel %vm621_vm2, %v617_v40, %v569_v41  ;;  %v635_v45 = vsel %vm621_vm2, %v593_v42, %v553_v44 }
  0xc4   : > { %995 = vmatprep.subr.msk.bf16.mxu0 %vm655_vm0, %v651_v43  ;;  %v671_v46 = vsel %vm655_vm0, %v635_v45, 0 }
  0xc6   : > { %v459_v47 = vpop.permute.xlu1 %458  ;;  %v443_v49 = vpop.permute.xlu0 %442  ;;  %984 = vmatpush3.bf16.xpose.msra.mxu0 %v671_v46 }
  0xc7   : > { %v620_v51 = vsel %vm572_vm1, %v1101_v48, %v459_v47  ;;  %v596_v53 = vsel %vm572_vm1, %v1102_v50, %v443_v49 }
  0xca   : > { %v571_v52 = vpop.permute.xlu1 %570  ;;  %v555_v55 = vpop.permute.xlu0 %554 }
  0xcb   : > { %v653_v54 = vsel %vm621_vm2, %v620_v51, %v571_v52  ;;  %v637_v56 = vsel %vm621_vm2, %v596_v53, %v555_v55 }
  0xcc   : > { %996 = vmatprep.subr.msk.bf16.mxu0 %vm655_vm0, %v653_v54  ;;  %v673_v57 = vsel %vm655_vm0, %v637_v56, 0 }
  0xce   : > { %986 = vmatpush3.bf16.xpose.msra.mxu0 %v673_v57 }
  0xd5   : > { %988 = vmatmul.mubr.msk.bf16.vlgmr.msra.gmra.mrb[0].mxu0 %vm655_vm0, %v1320_v28 }
 0x1a8   : > { %v725_v58 = vpop.f32.mrb[0].mxu0 }
 0x1a9   : > { %v735_v59 = vmul.f32 %v725_v58, %v725_v58  ;;  %v727_v60 = vpop.f32.mrb[1].mxu0 }
 0x1aa   : > { %v736_v61 = vmul.f32 %v727_v60, %v727_v60  ;;  %v729_v62 = vpop.f32.mrb[2].mxu0  ;;  %v732_v63 = vadd.f32 %v727_v60, %v725_v58 }
 0x1ab   : > { %v730_v0 = vpop.f32.mrb[3].mxu0 }
 0x1ac   : > { %733 = vadd.xlane.f32.xlu0 %v732_v63  ;;  %v737_v1 = vadd.f32 %v736_v61, %v735_v59 }
 0x1ae   : > { %738 = vadd.xlane.f32.xlu1 %v737_v1 }
 0x239   : > { %v734_v6 = vpop.xlane.xlu0 %733 }
 0x23a   : > { %v746_v7 = vrot.slane %v734_v6, %v745_v5 }
 0x23b   : > { %v739_v28 = vpop.xlane.xlu1 %738 }
 0x23c   : > { %v752_v8 = vrot.slane %v739_v28, %v745_v5 }
 0x23e   : > { %v755_v9 = vsel %vm754_vm3, %v746_v7, %v752_v8 }
 0x23f   : > { %757 = vst.msk [vmem:[%s150_s7] sm:$0x3] %vm756_vm4, %v755_v9 }
 0x240   : > { %1116 = shalt.err (!%p1113_p5)
}
 0x241   : > { %s1117_s26 = scalar_lea.hbm %s1405_s18, 32  ;;  %s1121_s29 = scalar_lea.hbm %s1454_s2, 64 }
 0x242   : > { %p1118_p6 = scmp.ne.s32.totalorder %s1405_s18, %s1117_s26  ;;  %p1122_p10 = scmp.lt.u32.totalorder %s1405_s18, %s1454_s2 }
 0x243   : > { %p1123_p11 = scmp.lt.u32.totalorder %s1121_s29, %s1117_s26  ;;  %p1125_p13 = scmp.lt.u32.totalorder %s1117_s26, %s1405_s18 }
 0x244   : > { %p1119_p7 = pnand %p1118_p6, %p1241_p4 }
 0x245   : > { %p1124_p12 = por %p1123_p11, %p1122_p10 }
 0x246   : > { %p1120_p9 = pneg %p1119_p7 }
 0x247   : > { %p1126_p0 = por %p1125_p13, %p1124_p12 }
 0x249   : > { %p1127_p1 = pnand %p1126_p0, %p1120_p9 }
 0x24b   : > { %1130 = shalt.err (!%p1127_p1)
}
 0x24c   : > { %998 = dma.vmem_to_hbm [thread:$0]  (%p1241_p4), %s1407_s8, 32, %s1405_s18, %s759_s12  }
 0x24d PF: > { %p1004_p2 = scmp.ge.s32.totalorder %s1181_s14, 2  ;;  %s785_s4 = sand.u32 1, %s1161_s9  }
 0x24e   : > { %s786_s5 = scalar_lea.sflag [#allocation3], %s785_s4 }
 0x24f   : > { %p1001_p3 = pnand %p1004_p2, %p1248_p8 }
 0x251   : > { %1156 = dma.done.wait (!%p1001_p3), %s786_s5, 32  }
 0x252   : > { %1158 = vsyncadd (!%p1001_p3), %s786_s5, 4294967264  ;;  %s15_s14 = sadd.s32 1, %s1181_s14   ;;  %s1457_s9 = smov %s1165_s10 }
 0x253   : > { %p12_p5 = scmp.ge.s32.totalorder %s15_s14, 4   ;;  %s1458_s10 = smov %s1169_s11 }
 0x254   : > { %s1459_s11 = smov %s1254_s22  ;;  %s1460_s12 = smov %s1177_s13 }
 0x255   : > { %s1461_s13 = smov %s1463_s17  ;;  %14 = sbr.rel (!%p12_p5) target bundleno = 4 (0x4), region = 66 }
 0x25c   :  { %791 = vsyncpa [#allocation3], 1 }
 0x25d   :  { %793 = vsyncpa [#allocation3 + $0x1], 1 }

</bundles_post_ra>
